<compile_context>
chip_gen: v6e
topology: v6e:2x2x1
jax: 0.10.0
libtpu: 0.0.40
codegen_flags: <defaults>
</compile_context>

<pallas_src>
import functools

import jax
import jax.numpy as jnp
from jax.experimental import pallas as pl
from jax.experimental.pallas import tpu as pltpu


def _efficient_attention_kernel(x_ref, wqkv_ref, bqkv_ref, mask_ref,
                                wr_ref, br_ref, o_ref,
                                *, Kc, Vc, hk, head_count, nb, hw_real):
    hw_pad = x_ref.shape[-1]

    # Grid-invariant operands: load once per step, reuse across images.
    w_qkv = wqkv_ref[...]                                   # (C3, Cin) bf16
    b_qkv = bqkv_ref[...]                                   # (C3, 1)  f32
    head_mask = mask_ref[...]                               # (Vc, Kc) f32
    w_r = wr_ref[...]                                       # (Cin, Vc) bf16
    b_r = br_ref[...]                                       # (Cin, 1) f32

    # Small static loop over the images of this block (nb is capped at 8).
    for i in range(nb):
        # Cast to bf16 in VMEM right before the MXU (input stays native dtype
        # in HBM).
        x = x_ref[i].astype(jnp.bfloat16)                   # (Cin, HWp)

        # Fused Q/K/V 1x1 conv: (2Kc+Vc, Cin) @ (Cin, HWp), f32 accumulation.
        qkv = jnp.dot(w_qkv, x, preferred_element_type=jnp.float32) + b_qkv
        q = qkv[:Kc]                                        # (Kc, HWp) f32
        k = qkv[Kc:2 * Kc]                                  # (Kc, HWp) f32
        v = qkv[2 * Kc:].astype(jnp.bfloat16)               # (Vc, HWp) bf16

        # Keys: softmax over the spatial (lane) axis; padded lanes (if any)
        # are masked so they contribute exp() = 0 to the normalization.
        if hw_pad != hw_real:
            lane = jax.lax.broadcasted_iota(jnp.int32, k.shape, 1)
            k = jnp.where(lane < hw_real, k, -1e30)
        k = k - jnp.max(k, axis=1, keepdims=True)
        ek = jnp.exp(k)
        k_sm = (ek * pl.reciprocal(jnp.sum(ek, axis=1, keepdims=True),
                                   approx=True)).astype(jnp.bfloat16)

        # Queries: softmax over the channel axis, independently per head.
        # Tile-aligned reshape + sublane reduction (no per-head slice/concat).
        if head_count > 1:
            qh = q.reshape(head_count, hk, hw_pad)
            qh = qh - jnp.max(qh, axis=1, keepdims=True)
            eq = jnp.exp(qh)
            q_sm = (eq * pl.reciprocal(jnp.sum(eq, axis=1, keepdims=True),
                                       approx=True)
                    ).reshape(Kc, hw_pad).astype(jnp.bfloat16)
        else:
            q = q - jnp.max(q, axis=0, keepdims=True)
            eq = jnp.exp(q)
            q_sm = (eq * pl.reciprocal(jnp.sum(eq, axis=0, keepdims=True),
                                       approx=True)).astype(jnp.bfloat16)

        # context^T for ALL heads in one NT matmul over the HW lanes:
        #   ctx_t[dv, ck] = sum_s v[dv, s] * k_sm[ck, s]     -> (Vc, Kc)
        ctx_t = jax.lax.dot_general(v, k_sm, (((1,), (1,)), ((), ())),
                                    preferred_element_type=jnp.float32)
        # Zero cross-head blocks (equivalent to per-head context matmuls).
        ctx_t = (ctx_t * head_mask).astype(jnp.bfloat16)

        # Attended values for all heads: (Vc, Kc) @ (Kc, HWp) -> (Vc, HWp)
        agg = jnp.dot(ctx_t, q_sm, preferred_element_type=jnp.float32)

        # Reprojection 1x1 conv: (Cin, Vc) @ (Vc, HWp) -> (Cin, HWp).
        out = jnp.dot(w_r, agg.astype(jnp.bfloat16),
                      preferred_element_type=jnp.float32) + b_r

        # Lane-dense store directly in the final output dtype.
        o_ref[i] = out.astype(o_ref.dtype)


def _default_vmem_limit_bytes():
    # Generation-aware limit: ~3/4 of physical VMEM, capped at 96 MiB.
    # v7x (64 MiB) -> 48 MiB, v5e/v6e (128 MiB) -> 96 MiB.
    cap = 64 * 1024 * 1024  # conservative fallback (safe on every generation)
    try:
        cap = int(getattr(pltpu.get_tpu_info(), "vmem_capacity_bytes", cap))
    except Exception:
        pass
    return int(min(cap * 3 // 4, 96 * 1024 * 1024))


def efficient_attention(x, wq, bq, wk, bk, wv, bv, wr, br, *, head_count=1,
                        vmem_limit_bytes=None,
                        target_block_bytes=2 * 1024 * 1024):
    N, Cin, H, W = x.shape
    Kc = wq.shape[0]
    Vc = wv.shape[0]
    assert Kc % head_count == 0 and Vc % head_count == 0
    hk = Kc // head_count
    hv = Vc // head_count
    HW = H * W
    HWp = ((HW + 127) // 128) * 128          # lane-dense (multiple of 128)
    C3 = 2 * Kc + Vc

    if vmem_limit_bytes is None:
        vmem_limit_bytes = _default_vmem_limit_bytes()

    # ---- glue (plain JAX): x is only reshaped (and padded if HW % 128 != 0);
    # no dtype-conversion pass over the activations.
    x_cm = x.reshape(N, Cin, HW)
    if HWp != HW:
        x_cm = jnp.pad(x_cm, ((0, 0), (0, 0), (0, HWp - HW)))

    wqkv = jnp.concatenate(
        [wq.reshape(Kc, Cin), wk.reshape(Kc, Cin), wv.reshape(Vc, Cin)],
        axis=0).astype(jnp.bfloat16)                              # (C3, Cin)
    bqkv = jnp.concatenate([bq, bk, bv]).reshape(C3, 1).astype(jnp.float32)
    wr_m = wr.reshape(Cin, Vc).astype(jnp.bfloat16)               # (Cin, Vc)
    br_m = br.reshape(Cin, 1).astype(jnp.float32)
    # Block-diagonal head mask for the stacked context matrix (Vc, Kc).
    head_mask = (jnp.arange(Vc)[:, None] // hv ==
                 jnp.arange(Kc)[None, :] // hk).astype(jnp.float32)

    # Images per grid step: amortize per-step overhead with ~MiB-sized blocks
    # (capped at 8 so the unrolled in-kernel loop stays short).
    per_img_bytes = Cin * HWp * x.dtype.itemsize
    nb_cap = int(max(1, min(8, target_block_bytes // max(per_img_bytes, 1))))
    nb = max(d for d in range(1, nb_cap + 1) if N % d == 0)

    kernel = functools.partial(_efficient_attention_kernel,
                               Kc=Kc, Vc=Vc, hk=hk, head_count=head_count,
                               nb=nb, hw_real=HW)

    out = pl.pallas_call(
        kernel,
        out_shape=jax.ShapeDtypeStruct((N, Cin, HWp), x.dtype),
        grid_spec=pltpu.PrefetchScalarGridSpec(
            num_scalar_prefetch=0,
            grid=(N // nb,),
            in_specs=[
                pl.BlockSpec((nb, Cin, HWp), lambda n: (n, 0, 0)),
                # Grid-invariant operands (cheap at these sizes).
                pl.BlockSpec((C3, Cin), lambda n: (0, 0)),
                pl.BlockSpec((C3, 1), lambda n: (0, 0)),
                pl.BlockSpec((Vc, Kc), lambda n: (0, 0)),
                pl.BlockSpec((Cin, Vc), lambda n: (0, 0)),
                pl.BlockSpec((Cin, 1), lambda n: (0, 0)),
            ],
            out_specs=pl.BlockSpec((nb, Cin, HWp), lambda n: (n, 0, 0))),
        compiler_params=pltpu.CompilerParams(
            dimension_semantics=("parallel",),
            vmem_limit_bytes=int(vmem_limit_bytes)),
    )(x_cm, wqkv, bqkv, head_mask, wr_m, br_m)

    if HWp != HW:
        out = out[..., :HW]
    return out.reshape(N, Cin, H, W)


def _reference(x, wq, bq, wk, bk, wv, bv, wr, br, head_count):
    # Pure-JAX f32 emulation of the PyTorch EfficientAttention forward.
    N, Cin, H, W = x.shape
    Kc = wq.shape[0]
    Vc = wv.shape[0]
    hw = H * W
    xf = x.reshape(N, Cin, hw)

    def conv1x1(w, b):
        return (jnp.einsum('oc,nch->noh', w.reshape(w.shape[0], Cin), xf)
                + b.reshape(1, -1, 1))

    keys = conv1x1(wk, bk)
    queries = conv1x1(wq, bq)
    values = conv1x1(wv, bv)
    hk = Kc // head_count
    hv = Vc // head_count
    outs = []
    for i in range(head_count):
        key = jax.nn.softmax(keys[:, i * hk:(i + 1) * hk, :], axis=2)
        query = jax.nn.softmax(queries[:, i * hk:(i + 1) * hk, :], axis=1)
        value = values[:, i * hv:(i + 1) * hv, :]
        context = jnp.einsum('nks,nvs->nkv', key, value)
        attended = jnp.einsum('nkv,nks->nvs', context, query)
        outs.append(attended)
    agg = jnp.concatenate(outs, axis=1)                     # (N, Vc, hw)
    out = (jnp.einsum('ov,nvs->nos', wr.reshape(Cin, Vc), agg)
           + br.reshape(1, -1, 1))
    return out.reshape(N, Cin, H, W)


if __name__ == "__main__":
    key = jax.random.PRNGKey(0)
    ks = jax.random.split(key, 9)

    N, Cin, H, W = 2, 32, 16, 16
    key_channels, value_channels, head_count = 32, 32, 2

    x = jax.random.normal(ks[0], (N, Cin, H, W), dtype=jnp.float32)
    wq = 0.1 * jax.random.normal(ks[1], (key_channels, Cin, 1, 1), jnp.float32)
    bq = 0.1 * jax.random.normal(ks[2], (key_channels,), jnp.float32)
    wk = 0.1 * jax.random.normal(ks[3], (key_channels, Cin, 1, 1), jnp.float32)
    bk = 0.1 * jax.random.normal(ks[4], (key_channels,), jnp.float32)
    wv = 0.1 * jax.random.normal(ks[5], (value_channels, Cin, 1, 1), jnp.float32)
    bv = 0.1 * jax.random.normal(ks[6], (value_channels,), jnp.float32)
    wr = 0.1 * jax.random.normal(ks[7], (Cin, value_channels, 1, 1), jnp.float32)
    br = 0.1 * jax.random.normal(ks[8], (Cin,), jnp.float32)

    out = efficient_attention(x, wq, bq, wk, bk, wv, bv, wr, br,
                              head_count=head_count)
    out = jax.block_until_ready(out)

    ref = _reference(x, wq, bq, wk, bk, wv, bv, wr, br, head_count)
    assert out.shape == (N, Cin, H, W)
    assert out.dtype == x.dtype
    rel_err = jnp.linalg.norm(out - ref) / jnp.linalg.norm(ref)
    assert rel_err < 2e-2, f"relative L2 error too large: {rel_err}"
    assert jnp.allclose(out, ref, atol=5e-2, rtol=5e-2), "mismatch vs reference"

    print("KERNEL_OK")
</pallas_src>

<mosaic_0001>
module attributes {stable_mosaic.version = 11 : i64} {
  func.func @_efficient_attention_kernel(%arg0: i32, %arg1: memref<2x32x256xf32, #tpu.memory_space<vmem>>, %arg2: memref<96x32xbf16, #tpu.memory_space<vmem>>, %arg3: memref<96x1xf32, #tpu.memory_space<vmem>>, %arg4: memref<32x32xf32, #tpu.memory_space<vmem>>, %arg5: memref<32x32xbf16, #tpu.memory_space<vmem>>, %arg6: memref<32x1xf32, #tpu.memory_space<vmem>>, %arg7: memref<2x32x256xf32, #tpu.memory_space<vmem>>) attributes {dimension_semantics = [#tpu.dimension_semantics<parallel>], iteration_bounds = array<i64: 1>, scalar_prefetch = 0 : i64, scratch_operands = 0 : i64, tpu.core_type = #tpu.core_type<tc>, window_params = [{transform_indices = @transform_0, window_bounds = array<i64: 2, 32, 256>}, {pipeline_mode = #tpu.pipeline_mode<synchronous>, transform_indices = @transform_1, window_bounds = array<i64: 96, 32>}, {pipeline_mode = #tpu.pipeline_mode<synchronous>, transform_indices = @transform_2, window_bounds = array<i64: 96, 1>}, {pipeline_mode = #tpu.pipeline_mode<synchronous>, transform_indices = @transform_3, window_bounds = array<i64: 32, 32>}, {pipeline_mode = #tpu.pipeline_mode<synchronous>, transform_indices = @transform_4, window_bounds = array<i64: 32, 32>}, {pipeline_mode = #tpu.pipeline_mode<synchronous>, transform_indices = @transform_5, window_bounds = array<i64: 32, 1>}, {transform_indices = @transform_6, window_bounds = array<i64: 2, 32, 256>}]} {
    %c0 = arith.constant 0 : index
    %c0_0 = arith.constant 0 : index
    %0 = vector.load %arg2[%c0, %c0_0] : memref<96x32xbf16, #tpu.memory_space<vmem>>, vector<96x32xbf16>
    %c0_1 = arith.constant 0 : index
    %c0_2 = arith.constant 0 : index
    %1 = vector.load %arg3[%c0_1, %c0_2] : memref<96x1xf32, #tpu.memory_space<vmem>>, vector<96x1xf32>
    %c0_3 = arith.constant 0 : index
    %c0_4 = arith.constant 0 : index
    %2 = vector.load %arg4[%c0_3, %c0_4] : memref<32x32xf32, #tpu.memory_space<vmem>>, vector<32x32xf32>
    %c0_5 = arith.constant 0 : index
    %c0_6 = arith.constant 0 : index
    %3 = vector.load %arg5[%c0_5, %c0_6] : memref<32x32xbf16, #tpu.memory_space<vmem>>, vector<32x32xbf16>
    %c0_7 = arith.constant 0 : index
    %c0_8 = arith.constant 0 : index
    %4 = vector.load %arg6[%c0_7, %c0_8] : memref<32x1xf32, #tpu.memory_space<vmem>>, vector<32x1xf32>
    %c0_9 = arith.constant 0 : index
    %c0_10 = arith.constant 0 : index
    %c0_11 = arith.constant 0 : index
    %5 = vector.load %arg1[%c0_9, %c0_10, %c0_11] : memref<2x32x256xf32, #tpu.memory_space<vmem>>, vector<1x32x256xf32>
    %6 = vector.shape_cast %5 : vector<1x32x256xf32> to vector<32x256xf32>
    %7 = arith.truncf %6 : vector<32x256xf32> to vector<32x256xbf16>
    %cst = arith.constant dense<0.000000e+00> : vector<96x256xf32>
    %8 = tpu.matmul %0, %7, %cst {dimension_numbers = #tpu.dot_dimension_numbers<[1], [0], [0], [1], [0, 0, 1, 1], [], []>} : vector<96x32xbf16>, vector<32x256xbf16>, vector<96x256xf32> -> vector<96x256xf32>
    %9 = vector.broadcast %1 : vector<96x1xf32> to vector<96x256xf32>
    %10 = arith.addf %8, %9 : vector<96x256xf32>
    %11 = vector.extract_strided_slice %10 {offsets = [0, 0], sizes = [32, 256], strides = [1, 1]} : vector<96x256xf32> to vector<32x256xf32>
    %12 = vector.extract_strided_slice %10 {offsets = [32, 0], sizes = [32, 256], strides = [1, 1]} : vector<96x256xf32> to vector<32x256xf32>
    %13 = vector.extract_strided_slice %10 {offsets = [64, 0], sizes = [32, 256], strides = [1, 1]} : vector<96x256xf32> to vector<32x256xf32>
    %14 = arith.truncf %13 : vector<32x256xf32> to vector<32x256xbf16>
    %cst_12 = arith.constant dense<0xFF800000> : vector<32xf32>
    %15 = vector.multi_reduction <maximumf>, %12, %cst_12 [1] : vector<32x256xf32> to vector<32xf32>
    %16 = vector.shape_cast %15 : vector<32xf32> to vector<32x1xf32>
    %17 = vector.broadcast %16 : vector<32x1xf32> to vector<32x256xf32>
    %18 = arith.subf %12, %17 : vector<32x256xf32>
    %19 = math.exp %18 : vector<32x256xf32>
    %cst_13 = arith.constant dense<0.000000e+00> : vector<32xf32>
    %20 = vector.multi_reduction <add>, %19, %cst_13 [1] : vector<32x256xf32> to vector<32xf32>
    %21 = vector.shape_cast %20 : vector<32xf32> to vector<32x1xf32>
    %22 = tpu.reciprocal %21 {approx = true} : vector<32x1xf32> -> vector<32x1xf32>
    %23 = vector.broadcast %22 : vector<32x1xf32> to vector<32x256xf32>
    %24 = arith.mulf %19, %23 : vector<32x256xf32>
    %25 = arith.truncf %24 : vector<32x256xf32> to vector<32x256xbf16>
    %26 = vector.shape_cast %11 : vector<32x256xf32> to vector<2x16x256xf32>
    %cst_14 = arith.constant dense<0xFF800000> : vector<2x256xf32>
    %27 = vector.multi_reduction <maximumf>, %26, %cst_14 [1] : vector<2x16x256xf32> to vector<2x256xf32>
    %28 = vector.shape_cast %27 : vector<2x256xf32> to vector<2x1x256xf32>
    %29 = vector.broadcast %28 : vector<2x1x256xf32> to vector<2x16x256xf32>
    %30 = arith.subf %26, %29 : vector<2x16x256xf32>
    %31 = math.exp %30 : vector<2x16x256xf32>
    %cst_15 = arith.constant dense<0.000000e+00> : vector<2x256xf32>
    %32 = vector.multi_reduction <add>, %31, %cst_15 [1] : vector<2x16x256xf32> to vector<2x256xf32>
    %33 = vector.shape_cast %32 : vector<2x256xf32> to vector<2x1x256xf32>
    %34 = tpu.reciprocal %33 {approx = true} : vector<2x1x256xf32> -> vector<2x1x256xf32>
    %35 = vector.broadcast %34 : vector<2x1x256xf32> to vector<2x16x256xf32>
    %36 = arith.mulf %31, %35 : vector<2x16x256xf32>
    %37 = vector.shape_cast %36 : vector<2x16x256xf32> to vector<32x256xf32>
    %38 = arith.truncf %37 : vector<32x256xf32> to vector<32x256xbf16>
    %cst_16 = arith.constant dense<0.000000e+00> : vector<32x32xf32>
    %39 = tpu.matmul %14, %25, %cst_16 {dimension_numbers = #tpu.dot_dimension_numbers<[1], [1], [0], [0], [0, 0, 1, 0], [], []>} : vector<32x256xbf16>, vector<32x256xbf16>, vector<32x32xf32> -> vector<32x32xf32>
    %40 = arith.mulf %39, %2 : vector<32x32xf32>
    %41 = arith.truncf %40 : vector<32x32xf32> to vector<32x32xbf16>
    %cst_17 = arith.constant dense<0.000000e+00> : vector<32x256xf32>
    %42 = tpu.matmul %41, %38, %cst_17 {dimension_numbers = #tpu.dot_dimension_numbers<[1], [0], [0], [1], [0, 0, 1, 1], [], []>} : vector<32x32xbf16>, vector<32x256xbf16>, vector<32x256xf32> -> vector<32x256xf32>
    %43 = arith.truncf %42 : vector<32x256xf32> to vector<32x256xbf16>
    %cst_18 = arith.constant dense<0.000000e+00> : vector<32x256xf32>
    %44 = tpu.matmul %3, %43, %cst_18 {dimension_numbers = #tpu.dot_dimension_numbers<[1], [0], [0], [1], [0, 0, 1, 1], [], []>} : vector<32x32xbf16>, vector<32x256xbf16>, vector<32x256xf32> -> vector<32x256xf32>
    %45 = vector.broadcast %4 : vector<32x1xf32> to vector<32x256xf32>
    %46 = arith.addf %44, %45 : vector<32x256xf32>
    %c0_19 = arith.constant 0 : index
    %c0_20 = arith.constant 0 : index
    %c0_21 = arith.constant 0 : index
    %47 = vector.load %arg7[%c0_19, %c0_20, %c0_21] : memref<2x32x256xf32, #tpu.memory_space<vmem>>, vector<1x32x256xf32>
    %48 = vector.shape_cast %47 : vector<1x32x256xf32> to vector<32x256xf32>
    %49 = vector.shape_cast %46 : vector<32x256xf32> to vector<1x32x256xf32>
    tpu.vector_store %arg7[%c0_19, %c0_20, %c0_21], %49 {strides = array<i32>} : memref<2x32x256xf32, #tpu.memory_space<vmem>>, vector<1x32x256xf32>,
    %c1 = arith.constant 1 : index
    %c0_22 = arith.constant 0 : index
    %c0_23 = arith.constant 0 : index
    %50 = vector.load %arg1[%c1, %c0_22, %c0_23] : memref<2x32x256xf32, #tpu.memory_space<vmem>>, vector<1x32x256xf32>
    %51 = vector.shape_cast %50 : vector<1x32x256xf32> to vector<32x256xf32>
    %52 = arith.truncf %51 : vector<32x256xf32> to vector<32x256xbf16>
    %cst_24 = arith.constant dense<0.000000e+00> : vector<96x256xf32>
    %53 = tpu.matmul %0, %52, %cst_24 {dimension_numbers = #tpu.dot_dimension_numbers<[1], [0], [0], [1], [0, 0, 1, 1], [], []>} : vector<96x32xbf16>, vector<32x256xbf16>, vector<96x256xf32> -> vector<96x256xf32>
    %54 = vector.broadcast %1 : vector<96x1xf32> to vector<96x256xf32>
    %55 = arith.addf %53, %54 : vector<96x256xf32>
    %56 = vector.extract_strided_slice %55 {offsets = [0, 0], sizes = [32, 256], strides = [1, 1]} : vector<96x256xf32> to vector<32x256xf32>
    %57 = vector.extract_strided_slice %55 {offsets = [32, 0], sizes = [32, 256], strides = [1, 1]} : vector<96x256xf32> to vector<32x256xf32>
    %58 = vector.extract_strided_slice %55 {offsets = [64, 0], sizes = [32, 256], strides = [1, 1]} : vector<96x256xf32> to vector<32x256xf32>
    %59 = arith.truncf %58 : vector<32x256xf32> to vector<32x256xbf16>
    %cst_25 = arith.constant dense<0xFF800000> : vector<32xf32>
    %60 = vector.multi_reduction <maximumf>, %57, %cst_25 [1] : vector<32x256xf32> to vector<32xf32>
    %61 = vector.shape_cast %60 : vector<32xf32> to vector<32x1xf32>
    %62 = vector.broadcast %61 : vector<32x1xf32> to vector<32x256xf32>
    %63 = arith.subf %57, %62 : vector<32x256xf32>
    %64 = math.exp %63 : vector<32x256xf32>
    %cst_26 = arith.constant dense<0.000000e+00> : vector<32xf32>
    %65 = vector.multi_reduction <add>, %64, %cst_26 [1] : vector<32x256xf32> to vector<32xf32>
    %66 = vector.shape_cast %65 : vector<32xf32> to vector<32x1xf32>
    %67 = tpu.reciprocal %66 {approx = true} : vector<32x1xf32> -> vector<32x1xf32>
    %68 = vector.broadcast %67 : vector<32x1xf32> to vector<32x256xf32>
    %69 = arith.mulf %64, %68 : vector<32x256xf32>
    %70 = arith.truncf %69 : vector<32x256xf32> to vector<32x256xbf16>
    %71 = vector.shape_cast %56 : vector<32x256xf32> to vector<2x16x256xf32>
    %cst_27 = arith.constant dense<0xFF800000> : vector<2x256xf32>
    %72 = vector.multi_reduction <maximumf>, %71, %cst_27 [1] : vector<2x16x256xf32> to vector<2x256xf32>
    %73 = vector.shape_cast %72 : vector<2x256xf32> to vector<2x1x256xf32>
    %74 = vector.broadcast %73 : vector<2x1x256xf32> to vector<2x16x256xf32>
    %75 = arith.subf %71, %74 : vector<2x16x256xf32>
    %76 = math.exp %75 : vector<2x16x256xf32>
    %cst_28 = arith.constant dense<0.000000e+00> : vector<2x256xf32>
    %77 = vector.multi_reduction <add>, %76, %cst_28 [1] : vector<2x16x256xf32> to vector<2x256xf32>
    %78 = vector.shape_cast %77 : vector<2x256xf32> to vector<2x1x256xf32>
    %79 = tpu.reciprocal %78 {approx = true} : vector<2x1x256xf32> -> vector<2x1x256xf32>
    %80 = vector.broadcast %79 : vector<2x1x256xf32> to vector<2x16x256xf32>
    %81 = arith.mulf %76, %80 : vector<2x16x256xf32>
    %82 = vector.shape_cast %81 : vector<2x16x256xf32> to vector<32x256xf32>
    %83 = arith.truncf %82 : vector<32x256xf32> to vector<32x256xbf16>
    %cst_29 = arith.constant dense<0.000000e+00> : vector<32x32xf32>
    %84 = tpu.matmul %59, %70, %cst_29 {dimension_numbers = #tpu.dot_dimension_numbers<[1], [1], [0], [0], [0, 0, 1, 0], [], []>} : vector<32x256xbf16>, vector<32x256xbf16>, vector<32x32xf32> -> vector<32x32xf32>
    %85 = arith.mulf %84, %2 : vector<32x32xf32>
    %86 = arith.truncf %85 : vector<32x32xf32> to vector<32x32xbf16>
    %cst_30 = arith.constant dense<0.000000e+00> : vector<32x256xf32>
    %87 = tpu.matmul %86, %83, %cst_30 {dimension_numbers = #tpu.dot_dimension_numbers<[1], [0], [0], [1], [0, 0, 1, 1], [], []>} : vector<32x32xbf16>, vector<32x256xbf16>, vector<32x256xf32> -> vector<32x256xf32>
    %88 = arith.truncf %87 : vector<32x256xf32> to vector<32x256xbf16>
    %cst_31 = arith.constant dense<0.000000e+00> : vector<32x256xf32>
    %89 = tpu.matmul %3, %88, %cst_31 {dimension_numbers = #tpu.dot_dimension_numbers<[1], [0], [0], [1], [0, 0, 1, 1], [], []>} : vector<32x32xbf16>, vector<32x256xbf16>, vector<32x256xf32> -> vector<32x256xf32>
    %90 = vector.broadcast %4 : vector<32x1xf32> to vector<32x256xf32>
    %91 = arith.addf %89, %90 : vector<32x256xf32>
    %c1_32 = arith.constant 1 : index
    %c0_33 = arith.constant 0 : index
    %c0_34 = arith.constant 0 : index
    %92 = vector.load %arg7[%c1_32, %c0_33, %c0_34] : memref<2x32x256xf32, #tpu.memory_space<vmem>>, vector<1x32x256xf32>
    %93 = vector.shape_cast %92 : vector<1x32x256xf32> to vector<32x256xf32>
    %94 = vector.shape_cast %91 : vector<32x256xf32> to vector<1x32x256xf32>
    tpu.vector_store %arg7[%c1_32, %c0_33, %c0_34], %94 {strides = array<i32>} : memref<2x32x256xf32, #tpu.memory_space<vmem>>, vector<1x32x256xf32>,
    return
  }
  func.func @transform_0(%arg0: i32) -> (i32, i32, i32) {
    %c0_i32 = arith.constant 0 : i32
    %c0_i32_0 = arith.constant 0 : i32
    %c0_i32_1 = arith.constant 0 : i32
    return %arg0, %c0_i32, %c0_i32_0 : i32, i32, i32
  }
  func.func @transform_1(%arg0: i32) -> (i32, i32) {
    %c0_i32 = arith.constant 0 : i32
    %c0_i32_0 = arith.constant 0 : i32
    %c0_i32_1 = arith.constant 0 : i32
    return %c0_i32, %c0_i32_0 : i32, i32
  }
  func.func @transform_2(%arg0: i32) -> (i32, i32) {
    %c0_i32 = arith.constant 0 : i32
    %c0_i32_0 = arith.constant 0 : i32
    %c0_i32_1 = arith.constant 0 : i32
    return %c0_i32, %c0_i32_0 : i32, i32
  }
  func.func @transform_3(%arg0: i32) -> (i32, i32) {
    %c0_i32 = arith.constant 0 : i32
    %c0_i32_0 = arith.constant 0 : i32
    %c0_i32_1 = arith.constant 0 : i32
    return %c0_i32, %c0_i32_0 : i32, i32
  }
  func.func @transform_4(%arg0: i32) -> (i32, i32) {
    %c0_i32 = arith.constant 0 : i32
    %c0_i32_0 = arith.constant 0 : i32
    %c0_i32_1 = arith.constant 0 : i32
    return %c0_i32, %c0_i32_0 : i32, i32
  }
  func.func @transform_5(%arg0: i32) -> (i32, i32) {
    %c0_i32 = arith.constant 0 : i32
    %c0_i32_0 = arith.constant 0 : i32
    %c0_i32_1 = arith.constant 0 : i32
    return %c0_i32, %c0_i32_0 : i32, i32
  }
  func.func @transform_6(%arg0: i32) -> (i32, i32, i32) {
    %c0_i32 = arith.constant 0 : i32
    %c0_i32_0 = arith.constant 0 : i32
    %c0_i32_1 = arith.constant 0 : i32
    return %arg0, %c0_i32, %c0_i32_0 : i32, i32, i32
  }
}

</mosaic_0001>

<bundles_post_ra>
// kernel: tpu_custom_call.1
= control target key start
LH: loop header
LB: loop body
LE: loop exit
PB: predicated region body
PF: predicated region fallthrough
CT: control target
= control target key end

     0   :  { %v1990_v7 = vmov 0   ;;  %vm163_vm0 = vcmask 261120   ;;  %s1983_s0 = inlined_call_operand.vmem [shape: f32[2,32,256], index: 0, kind: input, shape index: {}]   ;;  %s1984_s1 = inlined_call_operand.vmem [shape: bf16[96,32], index: 1, kind: input, shape index: {}]   ;;  %s1985_s2 = inlined_call_operand.vmem [shape: f32[96,1], index: 2, kind: input, shape index: {}]   ;;  %s1986_s3 = inlined_call_operand.vmem [shape: f32[32,32], index: 3, kind: input, shape index: {}]   ;;  %s1987_s4 = inlined_call_operand.vmem [shape: bf16[32,32], index: 4, kind: input, shape index: {}]   ;;  %s1988_s5 = inlined_call_operand.vmem [shape: f32[32,1], index: 5, kind: input, shape index: {}]   ;;  %s1989_s6 = inlined_call_operand.hbm [shape: f32[2,32,256], index: 6, kind: output, shape index: {}]  }
   0x1   :  { %v66_v0 = vld [vmem:[%s1983_s0 + $0x28] sm:$0xff]  ;;  %v68_v1 = vld [vmem:[%s1983_s0 + $0x38] sm:$0xff]  ;;  %v65_v2 = vld [vmem:[%s1983_s0 + $0x20] sm:$0xff]  ;;  %214 = vmatprep.mubr.bf16.mxu0 %v1990_v7  ;;  %1161 = vset.pattern.permute.xlu1 %v1990_v7 }
   0x2   :  { %v72_v3 = vpack.c.bf16 %v68_v1, %v66_v0  ;;  %v67_v4 = vld [vmem:[%s1983_s0 + $0x30] sm:$0xff]  ;;  %v62_v5 = vld [vmem:[%s1983_s0 + $0x8] sm:$0xff]  ;;  %v64_v6 = vld [vmem:[%s1983_s0 + $0x18] sm:$0xff]  ;;  %1160 = vset.pattern.permute.xlu0 %v1990_v7 }
   0x3   :  { %v71_v8 = vpack.c.bf16 %v67_v4, %v65_v2  ;;  %v70_v9 = vpack.c.bf16 %v64_v6, %v62_v5  ;;  %v61_v10 = vld [vmem:[%s1983_s0] sm:$0xff]  ;;  %v63_v11 = vld [vmem:[%s1983_s0 + $0x10] sm:$0xff]  ;;  %v1143_v14 = vld [vmem:[%s1983_s0 + $0x68] sm:$0xff] }
   0x4   :  { %194 = vmatprep.subr.bf16.mxu0 %v72_v3  ;;  %v69_v12 = vpack.c.bf16 %v63_v11, %v61_v10  ;;  %v1162_v13 = vld [vmem:[%s1984_s1] sm:$0xff]   ;;  %v1145_v15 = vld [vmem:[%s1983_s0 + $0x78] sm:$0xff]  ;;  %v1144_v17 = vld [vmem:[%s1983_s0 + $0x70] sm:$0xff] }
   0x5   :  { %195 = vmatpush1.bf16.msra.mxu0 %v71_v8  ;;  %v1142_v16 = vld [vmem:[%s1983_s0 + $0x60] sm:$0xff]  ;;  %v666_v18 = vpack.c.bf16 %v1145_v15, %v1143_v14  ;;  %v1139_v20 = vld [vmem:[%s1983_s0 + $0x48] sm:$0xff]  ;;  %v1141_v21 = vld [vmem:[%s1983_s0 + $0x58] sm:$0xff] }
   0x6   :  { %196 = vmatprep.subr.bf16.mxu0 %v70_v9  ;;  %v665_v19 = vpack.c.bf16 %v1144_v17, %v1142_v16  ;;  %v1138_v22 = vld [vmem:[%s1983_s0 + $0x40] sm:$0xff]  ;;  %v664_v23 = vpack.c.bf16 %v1141_v21, %v1139_v20  ;;  %v1140_v24 = vld [vmem:[%s1983_s0 + $0x50] sm:$0xff]  ;;  %v42_v28 = vld [vmem:[%s1985_s2 + $0x28] sm:$0xff] }
   0x7   :  { %v41_v25 = vld [vmem:[%s1985_s2 + $0x20] sm:$0xff]  ;;  %v43_v26 = vld [vmem:[%s1985_s2 + $0x30] sm:$0xff]  ;;  %v663_v27 = vpack.c.bf16 %v1140_v24, %v1138_v22 }
   0x8   :  { %95 = vperm.xlu1 %1161, %v41_v25   ;;  %105 = vperm.xlu0 %1160, %v43_v26  }
   0x9   :  { %197 = vmatpush1.bf16.msra.mxu0 %v69_v12 }
   0xa   :  { %679 = vmatprep.subr.bf16.mxu0 %v666_v18 }
   0xc   :  { %1126 = vmatmul.mubr.msk.bf16.vlgmr.msra.gmra.mxu0 %vm163_vm0, %v1162_v13 }
   0xd   :  { %224 = vmatprep.mubr.bf16.mxu0 %v1990_v7  ;;  %680 = vmatpush1.bf16.msra.mxu0 %v665_v19 }
   0xe   :  { %681 = vmatprep.subr.bf16.mxu0 %v664_v23 }
   0xf   :  { %11 = vsyncpa [#allocation3], 0  ;;  %v1163_v29 = vld [vmem:[%s1984_s1 + $0x8] sm:$0xff]   ;;  %v44_v30 = vld [vmem:[%s1985_s2 + $0x38] sm:$0xff]  ;;  %100 = vperm.xlu1 %1161, %v42_v28  }
  0x10   :  { %110 = vperm.xlu0 %1160, %v44_v30   ;;  %v1164_v31 = vld [vmem:[%s1984_s1 + $0x10] sm:$0xff]   ;;  %v1165_v32 = vld [vmem:[%s1984_s1 + $0x18] sm:$0xff]   ;;  %v1166_v33 = vld [vmem:[%s1984_s1 + $0x20] sm:$0xff]  }
  0x11   :  { %682 = vmatpush1.bf16.msra.mxu0 %v663_v27  ;;  %v1167_v34 = vld [vmem:[%s1984_s1 + $0x28] sm:$0xff]  }
  0x14   :  { %1127 = vmatmul.mubr.msk.bf16.gmra.mxu0 %vm163_vm0, %v1163_v29 }
  0x15   :  { %234 = vmatprep.mubr.bf16.mxu0 %v1990_v7 }
  0x1c   :  { %1128 = vmatmul.mubr.msk.bf16.gmra.mxu0 %vm163_vm0, %v1164_v31 }
  0x1d   :  { %244 = vmatprep.mubr.bf16.mxu0 %v1990_v7 }
  0x24   :  { %1129 = vmatmul.mubr.msk.bf16.gmra.mxu0 %vm163_vm0, %v1165_v32 }
  0x25   :  { %254 = vmatprep.mubr.bf16.mxu0 %v1990_v7 }
  0x2c   :  { %1130 = vmatmul.mubr.msk.bf16.gmra.mxu0 %vm163_vm0, %v1166_v33 }
  0x2d   :  { %264 = vmatprep.mubr.bf16.mxu0 %v1990_v7 }
  0x34   :  { %1131 = vmatmul.mubr.msk.bf16.gmra.mxu0 %vm163_vm0, %v1167_v34 }
  0x35   :  { %699 = vmatprep.mubr.bf16.mxu0 %v1990_v7 }
  0x3c   :  { %1146 = vmatmul.mubr.msk.bf16.vlgmr.msra.gmra.mxu0 %vm163_vm0, %v1162_v13 }
  0x3d   :  { %709 = vmatprep.mubr.bf16.mxu0 %v1990_v7 }
  0x44   :  { %1147 = vmatmul.mubr.msk.bf16.gmra.mxu0 %vm163_vm0, %v1163_v29 }
  0x45   :  { %719 = vmatprep.mubr.bf16.mxu0 %v1990_v7 }
  0x4c   :  { %1148 = vmatmul.mubr.msk.bf16.gmra.mxu0 %vm163_vm0, %v1164_v31 }
  0x4d   :  { %729 = vmatprep.mubr.bf16.mxu0 %v1990_v7 }
  0x54   :  { %1149 = vmatmul.mubr.msk.bf16.gmra.mxu0 %vm163_vm0, %v1165_v32 }
  0x55   :  { %739 = vmatprep.mubr.bf16.mxu0 %v1990_v7 }
  0x5c   :  { %1150 = vmatmul.mubr.msk.bf16.gmra.mxu0 %vm163_vm0, %v1166_v33 }
  0x5d   :  { %749 = vmatprep.mubr.bf16.mxu0 %v1990_v7 }
  0x64   :  { %1151 = vmatmul.mubr.msk.bf16.gmra.mxu0 %vm163_vm0, %v1167_v34 }
  0x83   :  { %v1447_v47 = vpop.permute.xlu0 %105  ;;  %v1449_v49 = vpop.permute.xlu1 %95 }
  0x8a   :  { %v1459_v61 = vpop.permute.xlu1 %100 }
  0x8b   :  { %v1454_v56 = vpop.permute.xlu0 %110 }
  0xcc   :  { %v1431_v35 = vpop.f32.mrf.mxu0 }
  0xce   :  { %v1433_v36 = vpop.f32.mrf.mxu0 }
  0xd0   :  { %v1435_v37 = vpop.f32.mrf.mxu0 }
  0xd2   :  { %v1437_v38 = vpop.f32.mrf.mxu0 }
  0xd4   :  { %v1439_v39 = vpop.f32.mrf.mxu0 }
  0xd6   :  { %v1441_v40 = vpop.f32.mrf.mxu0 }
  0xd8   :  { %v1443_v41 = vpop.f32.mrf.mxu0 }
  0xda   :  { %v1445_v42 = vpop.f32.mrf.mxu0 }
  0xdc   :  { %v236_v43 = vpop.f32.mrf.mxu0 }
  0xdd   :  { %v237_v58 = vadd.f32 %v236_v43, %v1449_v49 }
  0xde   :  { %v238_v44 = vpop.f32.mrf.mxu0 }
  0xdf   :  { %v239_v54 = vadd.f32 %v238_v44, %v1449_v49 }
  0xe0   :  { %v240_v45 = vpop.f32.mrf.mxu0 }
  0xe1   :  { %v279_v0 = vmax.f32 %v237_v58, %v239_v54  ;;  %v241_v1 = vadd.f32 %v240_v45, %v1459_v61 }
  0xe2   :  { %v242_v46 = vpop.f32.mrf.mxu0 }
  0xe3   :  { %v243_v62 = vadd.f32 %v242_v46, %v1459_v61 }
  0xe4   :  { %v246_v48 = vpop.f32.mrf.mxu0 }
  0xe5   :  { %v247_v51 = vadd.f32 %v246_v48, %v1447_v47  ;;  %v282_v2 = vmax.f32 %v241_v1, %v243_v62 }
  0xe6   :  { %v248_v50 = vpop.f32.mrf.mxu0 }
  0xe7   :  { %v249_v52 = vadd.f32 %v248_v50, %v1447_v47 }
  0xe8   :  { %v250_v53 = vpop.f32.mrf.mxu0 }
  0xe9   :  { %v285_v55 = vmax.f32 %v247_v51, %v249_v52  ;;  %v251_v59 = vadd.f32 %v250_v53, %v1454_v56 }
  0xea   :  { %v252_v57 = vpop.f32.mrf.mxu0 }
  0xeb   :  { %v253_v60 = vadd.f32 %v252_v57, %v1454_v56  ;;  %286 = vmax.xlane.f32.xlu0 %v285_v55 }
  0xec   :  { %v1463_v3 = vpop.f32.mrf.mxu0 }
  0xed   :  { %v288_v63 = vmax.f32 %v251_v59, %v253_v60 }
  0xee   :  { %v1465_v4 = vpop.f32.mrf.mxu0 }
  0xef   :  { %289 = vmax.xlane.f32.xlu1 %v288_v63  ;;  %280 = vmax.xlane.f32.xlu0 %v279_v0  ;;  %v46_v0 = vld [vmem:[%s1985_s2 + $0x48] sm:$0xff] }
  0xf0   :  { %v1467_v9 = vpop.f32.mrf.mxu0 }
  0xf2   :  { %v1469_v21 = vpop.f32.mrf.mxu0 }
  0xf3   :  { %283 = vmax.xlane.f32.xlu0 %v282_v2 }
  0xf4   :  { %v1471_v28 = vpop.f32.mrf.mxu0 }
  0xf5   :  { %2006 = vst [vmem:[#allocation5_spill] sm:$0xff] %v1471_v28 }
  0xf6   :  { %v1473_v29 = vpop.f32.mrf.mxu0 }
  0xf8   :  { %v1479_v32 = vpop.f32.mrf.mxu0 }
  0xf9   :  { %2007 = vst [vmem:[#allocation6_spill] sm:$0xff] %v1479_v32 }
  0xfa   :  { %v1489_v45 = vpop.f32.mrf.mxu0 }
  0xfc   :  { %v1501_v53 = vpop.f32.mrf.mxu0 }
  0xfe   :  { %v1505_v55 = vpop.f32.mrf.mxu0 }
 0x100   :  { %v1507_v57 = vpop.f32.mrf.mxu0 }
 0x174   :  { %v287_v5 = vpop.xlane.xlu0 %286 }
 0x175   :  { %v295_v6 = vsub.f32 %v247_v51, %v287_v5  ;;  %v296_v8 = vsub.f32 %v249_v52, %v287_v5  ;;  %v39_v5 = vld [vmem:[%s1985_s2 + $0x10] sm:$0xff] }
 0x177   :  { %v307_v10 = vmul.f32 1.442695, %v295_v6  ;;  %v309_v11 = vmul.f32 1.442695, %v296_v8  ;;  %v40_v6 = vld [vmem:[%s1985_s2 + $0x18] sm:$0xff] }
 0x178   :  { %v290_v12 = vpop.xlane.xlu1 %289  ;;  %v281_v13 = vpop.xlane.xlu0 %280 }
 0x179   :  { %1170 = vpow2.f32 %v307_v10  ;;  %v297_v14 = vsub.f32 %v251_v59, %v290_v12  ;;  %v298_v15 = vsub.f32 %v253_v60, %v290_v12  ;;  %v291_v16 = vsub.f32 %v237_v58, %v281_v13  ;;  %v1509_v58 = vpop.f32.mrf.mxu0  ;;  %v45_v59 = vld [vmem:[%s1985_s2 + $0x40] sm:$0xff] }
 0x17a   :  { %1172 = vpow2.f32 %v309_v11  ;;  %v292_v17 = vsub.f32 %v239_v54, %v281_v13  ;;  %v37_v10 = vld [vmem:[%s1985_s2] sm:$0xff]  ;;  %v38_v11 = vld [vmem:[%s1985_s2 + $0x8] sm:$0xff] }
 0x17b   :  { %v311_v18 = vmul.f32 1.442695, %v297_v14  ;;  %v313_v19 = vmul.f32 1.442695, %v298_v15  ;;  %v299_v20 = vmul.f32 1.442695, %v291_v16  ;;  %v1514_v60 = vpop.f32.mrf.mxu0 }
 0x17c   :  { %v301_v22 = vmul.f32 1.442695, %v292_v17  ;;  %v284_v23 = vpop.xlane.xlu0 %283 }
 0x17d   :  { %1174 = vpow2.f32 %v311_v18  ;;  %v293_v24 = vsub.f32 %v241_v1, %v284_v23  ;;  %v294_v25 = vsub.f32 %v243_v62, %v284_v23  ;;  %v47_v62 = vld [vmem:[%s1985_s2 + $0x50] sm:$0xff]  ;;  %v1519_v63 = vpop.f32.mrf.mxu0  ;;  %v48_v1 = vld [vmem:[%s1985_s2 + $0x58] sm:$0xff] }
 0x17e   :  { %1176 = vpow2.f32 %v313_v19 }
 0x17f   :  { %1178 = vpow2.f32 %v299_v20  ;;  %v303_v26 = vmul.f32 1.442695, %v293_v24  ;;  %v305_v27 = vmul.f32 1.442695, %v294_v25  ;;  %v1527_v2 = vpop.f32.mrf.mxu0 }
 0x180   :  { %1180 = vpow2.f32 %v301_v22 }
 0x181   :  { %1182 = vpow2.f32 %v303_v26  ;;  %v1535_v8 = vpop.f32.mrf.mxu0 }
 0x182   :  { %1184 = vpow2.f32 %v305_v27 }
 0x183   :  { %v721_v12 = vpop.f32.mrf.mxu0 }
 0x184   :  { %v1555_v25 = vadd.f32 %v721_v12, %v1449_v49 }
 0x185   :  { %v723_v13 = vpop.f32.mrf.mxu0 }
 0x186   :  { %v1475_v30 = vpop.eup %1170  ;;  %v1550_v23 = vadd.f32 %v723_v13, %v1449_v49  ;;  %2011 = vst [vmem:[#allocation10_spill] sm:$0xff] %v1555_v25 }
 0x187   :  { %v1477_v31 = vpop.eup %1172  ;;  %v725_v14 = vpop.f32.mrf.mxu0 }
 0x188   :  { %v321_v33 = vadd.f32 %v1477_v31, %v1475_v30  ;;  %2010 = vst [vmem:[#allocation9_spill] sm:$0xff] %v1550_v23 }
 0x189   :  { %v727_v15 = vpop.f32.mrf.mxu0 }
 0x18a   :  { %v1483_v34 = vpop.eup %1174  ;;  %322 = vadd.xlane.f32.xlu1 %v321_v33  ;;  %v1561_v27 = vadd.f32 %v727_v15, %v1459_v61  ;;  %v764_v33 = vmax.f32 %v1555_v25, %v1550_v23 }
 0x18b   :  { %v1485_v43 = vpop.eup %1176  ;;  %v731_v16 = vpop.f32.mrf.mxu0 }
 0x18c   :  { %v1487_v44 = vpop.eup %1178  ;;  %v324_v46 = vadd.f32 %v1485_v43, %v1483_v34  ;;  %v1547_v20 = vadd.f32 %v731_v16, %v1447_v47  ;;  %2013 = vst [vmem:[#allocation12_spill] sm:$0xff] %v1561_v27 }
 0x18d   :  { %v1493_v48 = vpop.eup %1180  ;;  %v733_v17 = vpop.f32.mrf.mxu0 }
 0x18e   :  { %v1495_v50 = vpop.eup %1182  ;;  %325 = vadd.xlane.f32.xlu0 %v324_v46  ;;  %v315_v51 = vadd.f32 %v1493_v48, %v1487_v44  ;;  %v1544_v19 = vadd.f32 %v733_v17, %v1447_v47  ;;  %2009 = vst [vmem:[#allocation8_spill] sm:$0xff] %v1547_v20  ;;  %v1569_v46 = vadd.f32 %v725_v14, %v1459_v61 }
 0x18f   :  { %v1499_v52 = vpop.eup %1184  ;;  %v735_v18 = vpop.f32.mrf.mxu0 }
 0x190   :  { %316 = vadd.xlane.f32.xlu1 %v315_v51  ;;  %v318_v54 = vadd.f32 %v1499_v52, %v1495_v50  ;;  %2008 = vst [vmem:[#allocation7_spill] sm:$0xff] %v1544_v19  ;;  %v770_v24 = vmax.f32 %v1547_v20, %v1544_v19  ;;  %v1564_v47 = vadd.f32 %v735_v18, %v1454_v56  ;;  %2015 = vst [vmem:[#allocation14_spill] sm:$0xff] %v1569_v46 }
 0x191   :  { %v737_v22 = vpop.f32.mrf.mxu0  ;;  %v767_v51 = vmax.f32 %v1569_v46, %v1561_v27 }
 0x192   :  { %319 = vadd.xlane.f32.xlu0 %v318_v54  ;;  %v1558_v26 = vadd.f32 %v737_v22, %v1454_v56  ;;  %2014 = vst [vmem:[#allocation13_spill] sm:$0xff] %v1564_v47 }
 0x193   :  { %v741_v54 = vpop.f32.mrf.mxu0 }
 0x194   :  { %2012 = vst [vmem:[#allocation11_spill] sm:$0xff] %v1558_v26  ;;  %v773_v49 = vmax.f32 %v1564_v47, %v1558_v26 }
 0x1a1   :  { %115 = vperm.xlu1 %1161, %v45_v59   ;;  %v743_v59 = vpop.f32.mrf.mxu0 }
 0x1a5   :  { %125 = vperm.xlu1 %1161, %v47_v62   ;;  %v745_v62 = vpop.f32.mrf.mxu0 }
 0x1a8   :  { %120 = vperm.xlu0 %1160, %v46_v0   ;;  %v747_v0 = vpop.f32.mrf.mxu0 }
 0x1a9   :  { %130 = vperm.xlu1 %1161, %v48_v1  }
 0x1aa   :  { %v751_v61 = vpop.f32.mrf.mxu0 }
 0x1ac   :  { %85 = vperm.xlu0 %1160, %v39_v5  }
 0x1ad   :  { %90 = vperm.xlu1 %1161, %v40_v6  }
 0x1b0   :  { %75 = vperm.xlu0 %1160, %v37_v10  }
 0x1b1   :  { %80 = vperm.xlu1 %1161, %v38_v11   ;;  %v753_v11 = vpop.f32.mrf.mxu0 }
 0x1b3   :  { %v755_v14 = vpop.f32.mrf.mxu0 }
 0x1cf   :  { %771 = vmax.xlane.f32.xlu0 %v770_v24 }
 0x1d3   :  { %765 = vmax.xlane.f32.xlu0 %v764_v33 }
 0x1d5   :  { %774 = vmax.xlane.f32.xlu1 %v773_v49 }
 0x1d7   :  { %768 = vmax.xlane.f32.xlu0 %v767_v51 }
 0x213   :  { %v323_v56 = vpop.xlane.xlu1 %322 }
 0x214   :  { %1186 = vrcp.f32 %v323_v56 }
 0x217   :  { %v326_v1 = vpop.xlane.xlu0 %325 }
 0x218   :  { %1188 = vrcp.f32 %v326_v1  ;;  %v757_v1 = vpop.f32.mrf.mxu0 }
 0x219   :  { %v317_v5 = vpop.xlane.xlu1 %316 }
 0x21a   :  { %1190 = vrcp.f32 %v317_v5 }
 0x21b   :  { %v320_v6 = vpop.xlane.xlu0 %319 }
 0x21c   :  { %1192 = vrcp.f32 %v320_v6 }
 0x21d   :  { %v116_v10 = vpop.permute.xlu1 %115 }
 0x21e   :  { %v1578_v15 = vadd.f32 %v1463_v3, %v116_v10  ;;  %v1580_v16 = vadd.f32 %v741_v54, %v116_v10  ;;  %v1582_v17 = vadd.f32 %v743_v59, %v116_v10  ;;  %v259_v33 = vadd.f32 %v1465_v4, %v116_v10 }
 0x220   :  { %2017 = vst [vmem:[#allocation16_spill] sm:$0xff] %v1580_v16 }
 0x221   :  { %v1575_v12 = vpop.permute.xlu1 %125  ;;  %v1187_v13 = vpop.eup %1186 }
 0x222   :  { %2016 = vst [vmem:[#allocation15_spill] sm:$0xff] %v1575_v12  ;;  %v1586_v22 = vadd.f32 %v1473_v29, %v1575_v12  ;;  %v1593_v56 = vadd.f32 %v751_v61, %v1575_v12  ;;  %v1596_v3 = vadd.f32 %v753_v11, %v1575_v12  ;;  %v336_v59 = vmul.f32 %v1187_v13, %v1477_v31 }
 0x223   :  { %v121_v18 = vpop.permute.xlu0 %120  ;;  %v335_v29 = vmul.f32 %v1187_v13, %v1475_v30 }
 0x224   :  { %v1588_v24 = vadd.f32 %v745_v62, %v121_v18  ;;  %v263_v49 = vadd.f32 %v1469_v21, %v121_v18  ;;  %2019 = vst [vmem:[#allocation18_spill] sm:$0xff] %v1593_v56  ;;  %v1610_v21 = vadd.f32 %v1467_v9, %v121_v18  ;;  %v1612_v5 = vadd.f32 %v747_v0, %v121_v18 }
 0x225   :  { %v1189_v51 = vpop.eup %1188  ;;  %v1598_v54 = vpop.permute.xlu1 %130 }
 0x226   :  { %2018 = vst [vmem:[#allocation17_spill] sm:$0xff] %v1588_v24  ;;  %2020 = vst [vmem:[#allocation19_spill] sm:$0xff] %v1598_v54  ;;  %v1604_v62 = vadd.f32 %v1489_v45, %v1598_v54  ;;  %v1607_v4 = vadd.f32 %v755_v14, %v1598_v54  ;;  %v276_v10 = vpack.c.bf16 %v263_v49, %v259_v33 }
 0x227   :  { %v1191_v61 = vpop.eup %1190  ;;  %v86_v31 = vpop.permute.xlu0 %85  ;;  %v338_v30 = vmul.f32 %v1189_v51, %v1485_v43  ;;  %v337_v11 = vmul.f32 %v1189_v51, %v1483_v34  ;;  %v1631_v18 = vadd.f32 %v757_v1, %v1598_v54 }
 0x228   :  { %2021 = vst [vmem:[#allocation20_spill] sm:$0xff] %v1607_v4  ;;  %v1619_v45 = vadd.f32 %v1439_v39, %v86_v31  ;;  %v1622_v13 = vadd.f32 %v1441_v40, %v86_v31  ;;  %v1625_v9 = vadd.f32 %v1514_v60, %v86_v31  ;;  %v1628_v0 = vadd.f32 %v1519_v63, %v86_v31 }
 0x229   :  { %v1193_v14 = vpop.eup %1192  ;;  %v91_v33 = vpop.permute.xlu1 %90  ;;  %471 = vmatprep.mubr.bf16.mxu1 %v276_v10  ;;  %v342_v43 = vpack.c.bf16 %v338_v30, %v336_v59  ;;  %v341_v34 = vpack.c.bf16 %v337_v11, %v335_v29  ;;  %v1634_v39 = vmul.f32 %v1191_v61, %v1493_v48  ;;  %v1652_v48 = vmul.f32 %v1191_v61, %v1487_v44 }
 0x22a   :  { %v1637_v40 = vadd.f32 %v1443_v41, %v91_v33  ;;  %v1640_v60 = vadd.f32 %v1445_v42, %v91_v33  ;;  %v1643_v63 = vadd.f32 %v1527_v2, %v91_v33  ;;  %v1646_v49 = vadd.f32 %v1535_v8, %v91_v33 }
 0x22b   :  { %451 = vmatprep.subr.bf16.mxu1 %v342_v43  ;;  %v76_v51 = vpop.permute.xlu0 %75  ;;  %v1649_v59 = vmul.f32 %v1193_v14, %v1499_v52  ;;  %v1655_v41 = vmul.f32 %v1193_v14, %v1495_v50 }
 0x22c   :  { %v357_v2 = vmax.f32 %v1619_v45, %v1637_v40  ;;  %v364_v8 = vmax.f32 %v1622_v13, %v1640_v60  ;;  %v842_v29 = vmax.f32 %v1625_v9, %v1643_v63  ;;  %v849_v52 = vmax.f32 %v1628_v0, %v1646_v49  ;;  %452 = vmatpush1.bf16.xpose.msra.mxu1 %v341_v34 }
 0x22d   :  { %v81_v44 = vpop.permute.xlu1 %80  ;;  %v1668_v50 = vadd.f32 %v1431_v35, %v76_v51  ;;  %v1671_v1 = vadd.f32 %v1433_v36, %v76_v51  ;;  %v1674_v61 = vadd.f32 %v1501_v53, %v76_v51  ;;  %v1677_v31 = vadd.f32 %v1505_v55, %v76_v51 }
 0x22e   :  { %v358_v10 = vrot.slane %v357_v2, 4  ;;  %v365_v30 = vrot.slane %v364_v8, 4  ;;  %v843_v11 = vrot.slane %v842_v29, 4  ;;  %v850_v14 = vrot.slane %v849_v52, 4 }
 0x22f   :  { %v1680_v33 = vadd.f32 %v1435_v37, %v81_v44  ;;  %v1683_v43 = vadd.f32 %v1437_v38, %v81_v44  ;;  %v1686_v35 = vadd.f32 %v1507_v57, %v81_v44  ;;  %v1689_v36 = vadd.f32 %v1509_v58, %v81_v44 }
 0x230   :  { %v359_v53 = vmax.f32 %v357_v2, %v358_v10  ;;  %v366_v34 = vmax.f32 %v364_v8, %v365_v30  ;;  %v844_v55 = vmax.f32 %v842_v29, %v843_v11  ;;  %v851_v51 = vmax.f32 %v849_v52, %v850_v14 }
 0x231   :  { %v343_v6 = vmax.f32 %v1668_v50, %v1680_v33  ;;  %v350_v37 = vmax.f32 %v1671_v1, %v1683_v43  ;;  %v828_v38 = vmax.f32 %v1674_v61, %v1686_v35  ;;  %v835_v57 = vmax.f32 %v1677_v31, %v1689_v36 }
 0x232   :  { %v360_v7 = vrot.slane %v359_v53, 2  ;;  %v367_v42 = vrot.slane %v366_v34, 2  ;;  %v845_v58 = vrot.slane %v844_v55, 2  ;;  %v852_v44 = vrot.slane %v851_v51, 2 }
 0x233   :  { %v344_v2 = vrot.slane %v343_v6, 4  ;;  %v351_v8 = vrot.slane %v350_v37, 4  ;;  %v829_v29 = vrot.slane %v828_v38, 4  ;;  %v836_v52 = vrot.slane %v835_v57, 4 }
 0x234   :  { %v361_v10 = vmax.f32 %v359_v53, %v360_v7  ;;  %v368_v30 = vmax.f32 %v366_v34, %v367_v42  ;;  %v846_v11 = vmax.f32 %v844_v55, %v845_v58  ;;  %v853_v14 = vmax.f32 %v851_v51, %v852_v44 }
 0x235   :  { %v345_v16 = vmax.f32 %v343_v6, %v344_v2  ;;  %v352_v24 = vmax.f32 %v350_v37, %v351_v8  ;;  %v830_v27 = vmax.f32 %v828_v38, %v829_v29  ;;  %v837_v46 = vmax.f32 %v835_v57, %v836_v52  ;;  %v2024_v29 = vld [vmem:[#allocation20_spill] sm:$0xff] }
 0x236   :  { %v362_v26 = vrot.slane %v361_v10, 1  ;;  %v369_v47 = vrot.slane %v368_v30, 1  ;;  %v847_v23 = vrot.slane %v846_v11, 1  ;;  %v854_v25 = vrot.slane %v853_v14, 1 }
 0x237   :  { %v346_v19 = vrot.slane %v345_v16, 2  ;;  %v353_v20 = vrot.slane %v352_v24, 2  ;;  %v831_v28 = vrot.slane %v830_v27, 2  ;;  %v838_v12 = vrot.slane %v837_v46, 2 }
 0x238   :  { %v363_v32 = vmax.f32 %v361_v10, %v362_v26  ;;  %v370_v54 = vmax.f32 %v368_v30, %v369_v47  ;;  %v848_v4 = vmax.f32 %v846_v11, %v847_v23  ;;  %v855_v56 = vmax.f32 %v853_v14, %v854_v25  ;;  %v2026_v10 = vld [vmem:[#allocation6_spill] sm:$0xff]  ;;  %v2027_v14 = vld [vmem:[#allocation15_spill] sm:$0xff] }
 0x239   :  { %v347_v7 = vmax.f32 %v345_v16, %v346_v19  ;;  %v354_v42 = vmax.f32 %v352_v24, %v353_v20  ;;  %v832_v53 = vmax.f32 %v830_v27, %v831_v28  ;;  %v839_v34 = vmax.f32 %v837_v46, %v838_v12 }
 0x23a   :  { %v375_v6 = vsub.f32 %v1619_v45, %v363_v32  ;;  %v376_v55 = vsub.f32 %v1622_v13, %v370_v54  ;;  %v377_v51 = vsub.f32 %v1637_v40, %v363_v32  ;;  %v378_v37 = vsub.f32 %v1640_v60, %v370_v54 }
 0x23b   :  { %v860_v38 = vsub.f32 %v1625_v9, %v848_v4  ;;  %v861_v57 = vsub.f32 %v1628_v0, %v855_v56  ;;  %v862_v26 = vsub.f32 %v1643_v63, %v848_v4  ;;  %v863_v23 = vsub.f32 %v1646_v49, %v855_v56 }
 0x23c   :  { %v387_v19 = vmul.f32 1.442695, %v375_v6  ;;  %v389_v20 = vmul.f32 1.442695, %v376_v55  ;;  %v391_v28 = vmul.f32 1.442695, %v377_v51  ;;  %v340_v25 = vpack.c.bf16 %v1649_v59, %v1634_v39 }
 0x23d   :  { %v393_v27 = vmul.f32 1.442695, %v378_v37  ;;  %v872_v47 = vmul.f32 1.442695, %v860_v38  ;;  %v339_v32 = vpack.c.bf16 %v1655_v41, %v1652_v48  ;;  %v278_v46 = vpack.c.bf16 %v1604_v62, %v1586_v22 }
 0x23e   :  { %1194 = vpow2.f32 %v387_v19  ;;  %v874_v12 = vmul.f32 1.442695, %v861_v57  ;;  %v876_v16 = vmul.f32 1.442695, %v862_v26  ;;  %v348_v24 = vrot.slane %v347_v7, 1  ;;  %453 = vmatprep.subr.bf16.mxu1 %v340_v25 }
 0x23f   :  { %1196 = vpow2.f32 %v389_v20  ;;  %v355_v56 = vrot.slane %v354_v42, 1  ;;  %v833_v54 = vrot.slane %v832_v53, 1  ;;  %v840_v4 = vrot.slane %v839_v34, 1  ;;  %454 = vmatpush1.bf16.xpose.msra.mxu1 %v339_v32 }
 0x240   :  { %1198 = vpow2.f32 %v391_v28  ;;  %v878_v45 = vmul.f32 1.442695, %v863_v23  ;;  %v349_v13 = vmax.f32 %v347_v7, %v348_v24  ;;  %v761_v9 = vpack.c.bf16 %v1612_v5, %v1582_v17 }
 0x241   :  { %1200 = vpow2.f32 %v393_v27  ;;  %v356_v0 = vmax.f32 %v354_v42, %v355_v56  ;;  %v834_v39 = vmax.f32 %v832_v53, %v833_v54  ;;  %v841_v22 = vmax.f32 %v839_v34, %v840_v4 }
 0x242   :  { %1202 = vpow2.f32 %v872_v47  ;;  %v371_v62 = vsub.f32 %v1668_v50, %v349_v13  ;;  %v373_v40 = vsub.f32 %v1680_v33, %v349_v13  ;;  %v763_v60 = vpack.c.bf16 %v1631_v18, %v1596_v3 }
 0x243   :  { %1204 = vpow2.f32 %v874_v12  ;;  %v372_v63 = vsub.f32 %v1671_v1, %v356_v0  ;;  %v374_v49 = vsub.f32 %v1683_v43, %v356_v0  ;;  %v856_v59 = vsub.f32 %v1674_v61, %v834_v39  ;;  %v2023_v43 = vld [vmem:[#allocation18_spill] sm:$0xff] }
 0x244   :  { %1206 = vpow2.f32 %v876_v16  ;;  %v379_v48 = vmul.f32 1.442695, %v371_v62  ;;  %v383_v41 = vmul.f32 1.442695, %v373_v40  ;;  %v857_v58 = vsub.f32 %v1677_v31, %v841_v22  ;;  %v2025_v31 = vld [vmem:[#allocation19_spill] sm:$0xff] }
 0x245   :  { %1208 = vpow2.f32 %v878_v45  ;;  %v381_v44 = vmul.f32 1.442695, %v372_v63  ;;  %v385_v50 = vmul.f32 1.442695, %v374_v49  ;;  %v858_v33 = vsub.f32 %v1686_v35, %v834_v39 }
 0x246   :  { %1210 = vpow2.f32 %v379_v48  ;;  %v859_v2 = vsub.f32 %v1689_v36, %v841_v22  ;;  %v864_v8 = vmul.f32 1.442695, %v856_v59  ;;  %v2022_v1 = vpack.c.bf16 %v1610_v21, %v1578_v15  ;;  %v2028_v36 = vld [vmem:[#allocation5_spill] sm:$0xff] }
 0x247   :  { %1212 = vpow2.f32 %v381_v44  ;;  %v866_v61 = vmul.f32 1.442695, %v857_v58  ;;  %v762_v52 = vpack.c.bf16 %v2024_v29, %v2023_v43  ;;  %v271_v30 = vadd.f32 %v2026_v10, %v2025_v31  ;;  %v2030_v44 = vld [vmem:[#allocation8_spill] sm:$0xff] }
 0x248   :  { %472 = vmatmul.mubr.bf16.vlgmr.msra.gmra.mxu1 %v2022_v1  ;;  %1214 = vpow2.f32 %v383_v41  ;;  %v868_v11 = vmul.f32 1.442695, %v858_v33  ;;  %v870_v35 = vmul.f32 1.442695, %v859_v2  ;;  %v267_v7 = vadd.f32 %v2028_v36, %v2027_v14  ;;  %v2031_v33 = vld [vmem:[#allocation7_spill] sm:$0xff] }
 0x249   :  { %479 = vmatprep.mubr.bf16.mxu1 %v278_v46  ;;  %1216 = vpow2.f32 %v385_v50  ;;  %v2029_v37 = vmov 0  }
 0x24a   :  { %1218 = vpow2.f32 %v864_v8  ;;  %v277_v21 = vpack.c.bf16 %v271_v30, %v267_v7 }
 0x24b   :  { %v1734_v42 = vpop.eup %1194  ;;  %1220 = vpow2.f32 %v866_v61 }
 0x24c   :  { %v1736_v15 = vpop.eup %1196  ;;  %1222 = vpow2.f32 %v868_v11 }
 0x24d   :  { %v1738_v53 = vpop.eup %1198  ;;  %1224 = vpow2.f32 %v870_v35 }
 0x24e   :  { %v1740_v34 = vpop.eup %1200  ;;  %v409_v6 = vadd.f32 %v1738_v53, %v1734_v42 }
 0x24f   :  { %v1744_v55 = vpop.eup %1202  ;;  %v416_v51 = vadd.f32 %v1740_v34, %v1736_v15 }
 0x250   :  { %480 = vmatmul.mubr.bf16.gmra.mxu1 %v277_v21  ;;  %v1749_v38 = vpop.eup %1204  ;;  %v410_v57 = vrot.slane %v409_v6, 4 }
 0x251   :  { %532 = vmatprep.mubr.bf16.mxu1 %v2029_v37  ;;  %v1751_v26 = vpop.eup %1206  ;;  %v417_v23 = vrot.slane %v416_v51, 4 }
 0x252   :  { %v1753_v19 = vpop.eup %1208  ;;  %v411_v20 = vadd.f32 %v410_v57, %v409_v6  ;;  %v894_v28 = vadd.f32 %v1751_v26, %v1744_v55 }
 0x253   :  { %v1757_v25 = vpop.eup %1210  ;;  %v901_v27 = vadd.f32 %v1753_v19, %v1749_v38  ;;  %v418_v47 = vadd.f32 %v417_v23, %v416_v51  ;;  %v2032_v23 = vld [vmem:[#allocation10_spill] sm:$0xff] }
 0x254   :  { %v1761_v32 = vpop.eup %1212  ;;  %v412_v46 = vrot.slane %v411_v20, 2  ;;  %v895_v12 = vrot.slane %v894_v28, 4 }
 0x255   :  { %v1763_v16 = vpop.eup %1214  ;;  %v902_v24 = vrot.slane %v901_v27, 4  ;;  %v419_v56 = vrot.slane %v418_v47, 2 }
 0x256   :  { %v1765_v54 = vpop.eup %1216  ;;  %v896_v4 = vadd.f32 %v895_v12, %v894_v28  ;;  %v395_v45 = vadd.f32 %v1763_v16, %v1757_v25  ;;  %v413_v13 = vadd.f32 %v412_v46, %v411_v20  ;;  %v2033_v28 = vld [vmem:[#allocation9_spill] sm:$0xff] }
 0x257   :  { %v1769_v0 = vpop.eup %1218  ;;  %v402_v39 = vadd.f32 %v1765_v54, %v1761_v32  ;;  %v420_v22 = vadd.f32 %v419_v56, %v418_v47  ;;  %v903_v62 = vadd.f32 %v902_v24, %v901_v27  ;;  %v2034_v56 = vld [vmem:[#allocation13_spill] sm:$0xff] }
 0x258   :  { %v1773_v40 = vpop.eup %1220  ;;  %v897_v63 = vrot.slane %v896_v4, 2  ;;  %v396_v49 = vrot.slane %v395_v45, 4  ;;  %v772_v59 = vpop.xlane.xlu0 %771  ;;  %v414_v48 = vrot.slane %v413_v13, 1 }
 0x259   :  { %v1775_v41 = vpop.eup %1222  ;;  %v403_v58 = vrot.slane %v402_v39, 4  ;;  %v780_v50 = vsub.f32 %v2030_v44, %v772_v59  ;;  %v781_v2 = vsub.f32 %v2031_v33, %v772_v59  ;;  %v421_v8 = vrot.slane %v420_v22, 1 }
 0x25a   :  { %v1779_v1 = vpop.eup %1224  ;;  %v397_v61 = vadd.f32 %v396_v49, %v395_v45  ;;  %v880_v31 = vadd.f32 %v1775_v41, %v1769_v0  ;;  %v415_v10 = vadd.f32 %v414_v48, %v413_v13  ;;  %v904_v30 = vrot.slane %v903_v62, 2  ;;  %v2035_v13 = vld [vmem:[#allocation11_spill] sm:$0xff] }
 0x25b   :  { %v887_v11 = vadd.f32 %v1779_v1, %v1773_v40  ;;  %v792_v35 = vmul.f32 1.442695, %v780_v50  ;;  %v794_v14 = vmul.f32 1.442695, %v781_v2  ;;  %v422_v36 = vadd.f32 %v421_v8, %v420_v22  ;;  %v2036_v2 = vld [vmem:[#allocation14_spill] sm:$0xff] }
 0x25c   :  { %v398_v7 = vrot.slane %v397_v61, 2  ;;  %v881_v21 = vrot.slane %v880_v31, 4  ;;  %v766_v6 = vpop.xlane.xlu0 %765  ;;  %1226 = vrcp.f32 %v415_v10  ;;  %v404_v51 = vadd.f32 %v403_v58, %v402_v39 }
 0x25d   :  { %v888_v57 = vrot.slane %v887_v11, 4  ;;  %1228 = vpow2.f32 %v792_v35  ;;  %v776_v20 = vsub.f32 %v2032_v23, %v766_v6  ;;  %v777_v27 = vsub.f32 %v2033_v28, %v766_v6 }
 0x25e   :  { %v882_v47 = vadd.f32 %v881_v21, %v880_v31  ;;  %1230 = vpow2.f32 %v794_v14  ;;  %v775_v46 = vpop.xlane.xlu1 %774  ;;  %v405_v12 = vrot.slane %v404_v51, 2  ;;  %v399_v24 = vadd.f32 %v398_v7, %v397_v61  ;;  %v2037_v31 = vld [vmem:[#allocation12_spill] sm:$0xff] }
 0x25f   :  { %v782_v45 = vsub.f32 %v2034_v56, %v775_v46  ;;  %v783_v22 = vsub.f32 %v2035_v13, %v775_v46  ;;  %v784_v49 = vmul.f32 1.442695, %v776_v20  ;;  %v786_v59 = vmul.f32 1.442695, %v777_v27 }
 0x260   :  { %v883_v48 = vrot.slane %v882_v47, 2  ;;  %v769_v44 = vpop.xlane.xlu0 %768  ;;  %1232 = vrcp.f32 %v422_v36  ;;  %v406_v39 = vadd.f32 %v405_v12, %v404_v51  ;;  %v400_v58 = vrot.slane %v399_v24, 1 }
 0x261   :  { %v796_v50 = vmul.f32 1.442695, %v782_v45  ;;  %v798_v33 = vmul.f32 1.442695, %v783_v22  ;;  %1234 = vpow2.f32 %v784_v49  ;;  %v778_v8 = vsub.f32 %v2036_v2, %v769_v44 }
 0x262   :  { %1236 = vpow2.f32 %v786_v59  ;;  %v779_v10 = vsub.f32 %v2037_v31, %v769_v44  ;;  %v407_v61 = vrot.slane %v406_v39, 1  ;;  %v401_v35 = vadd.f32 %v400_v58, %v399_v24 }
 0x263   :  { %1238 = vpow2.f32 %v796_v50  ;;  %v788_v14 = vmul.f32 1.442695, %v778_v8  ;;  %v905_v7 = vadd.f32 %v904_v30, %v903_v62  ;;  %v898_v21 = vadd.f32 %v897_v63, %v896_v4 }
 0x264   :  { %1240 = vpow2.f32 %v798_v33  ;;  %v790_v6 = vmul.f32 1.442695, %v779_v10  ;;  %v408_v23 = vadd.f32 %v407_v61, %v406_v39  ;;  %v889_v36 = vadd.f32 %v888_v57, %v887_v11 }
 0x265   :  { %1242 = vpow2.f32 %v788_v14  ;;  %v906_v51 = vrot.slane %v905_v7, 1  ;;  %v899_v20 = vrot.slane %v898_v21, 1  ;;  %v884_v28 = vadd.f32 %v883_v48, %v882_v47 }
 0x266   :  { %1244 = vpow2.f32 %v790_v6  ;;  %v890_v27 = vrot.slane %v889_v36, 2 }
 0x267   :  { %1246 = vrcp.f32 %v408_v23  ;;  %v907_v46 = vadd.f32 %v906_v51, %v905_v7  ;;  %v900_v12 = vadd.f32 %v899_v20, %v898_v21  ;;  %v885_v56 = vrot.slane %v884_v28, 1 }
 0x268   :  { %1248 = vrcp.f32 %v401_v35  ;;  %v891_v24 = vadd.f32 %v890_v27, %v889_v36 }
 0x269   :  { %v1227_v45 = vpop.eup %1226  ;;  %1250 = vrcp.f32 %v907_v46  ;;  %v886_v62 = vadd.f32 %v885_v56, %v884_v28  ;;  %v59_v46 = vld [vmem:[%s1988_s5 + $0x10] sm:$0xff]  ;;  %v1870_v56 = vld [vmem:[%s1986_s3] sm:$0xff] }
 0x26a   :  { %v1791_v4 = vpop.eup %1228  ;;  %1252 = vrcp.f32 %v900_v12  ;;  %v892_v63 = vrot.slane %v891_v24, 1  ;;  %v431_v11 = vmul.f32 %v1227_v45, %v1734_v42  ;;  %v433_v57 = vmul.f32 %v1227_v45, %v1738_v53  ;;  %v1875_v45 = vld [vmem:[%s1986_s3 + $0x8] sm:$0xff] }
 0x26b   :  { %v1793_v30 = vpop.eup %1230  ;;  %1254 = vrcp.f32 %v886_v62 }
 0x26c   :  { %v806_v47 = vadd.f32 %v1793_v30, %v1791_v4  ;;  %v893_v13 = vadd.f32 %v892_v63, %v891_v24  ;;  %v437_v39 = vpack.c.bf16 %v433_v57, %v431_v11 }
 0x26d   :  { %v1233_v22 = vpop.eup %1232 }
 0x26e   :  { %v1799_v49 = vpop.eup %1234  ;;  %v432_v59 = vmul.f32 %v1233_v22, %v1736_v15  ;;  %v434_v48 = vmul.f32 %v1233_v22, %v1740_v34  ;;  %807 = vadd.xlane.f32.xlu1 %v806_v47  ;;  %1256 = vrcp.f32 %v893_v13  ;;  %v1883_v22 = vld [vmem:[%s1986_s3 + $0x10] sm:$0xff] }
 0x26f   :  { %v1803_v44 = vpop.eup %1236 }
 0x270   :  { %v1805_v42 = vpop.eup %1238  ;;  %v438_v53 = vpack.c.bf16 %v434_v48, %v432_v59  ;;  %v800_v58 = vadd.f32 %v1803_v44, %v1799_v49  ;;  %v1888_v48 = vld [vmem:[%s1986_s3 + $0x18] sm:$0xff] }
 0x271   :  { %v1809_v50 = vpop.eup %1240 }
 0x272   :  { %v1811_v33 = vpop.eup %1242  ;;  %512 = vmatprep.subr.bf16.mxu1 %v438_v53  ;;  %v809_v15 = vadd.f32 %v1809_v50, %v1805_v42  ;;  %801 = vadd.xlane.f32.xlu1 %v800_v58 }
 0x273   :  { %v1815_v34 = vpop.eup %1244  ;;  %513 = vmatpush1.bf16.msra.mxu1 %v437_v39 }
 0x274   :  { %v1247_v2 = vpop.eup %1246  ;;  %810 = vadd.xlane.f32.xlu0 %v809_v15  ;;  %v803_v8 = vadd.f32 %v1815_v34, %v1811_v33 }
 0x275   :  { %v1249_v31 = vpop.eup %1248  ;;  %v428_v10 = vmul.f32 %v1247_v2, %v1761_v32  ;;  %v430_v61 = vmul.f32 %v1247_v2, %v1765_v54 }
 0x276   :  { %v1251_v35 = vpop.eup %1250  ;;  %v427_v14 = vmul.f32 %v1249_v31, %v1757_v25  ;;  %v429_v7 = vmul.f32 %v1249_v31, %v1763_v16 }
 0x277   :  { %v1253_v21 = vpop.eup %1252  ;;  %v436_v6 = vpack.c.bf16 %v430_v61, %v428_v10  ;;  %v1824_v23 = vmul.f32 %v1251_v35, %v1749_v38  ;;  %v1827_v36 = vmul.f32 %v1251_v35, %v1753_v19 }
 0x278   :  { %v1255_v51 = vpop.eup %1254  ;;  %v435_v20 = vpack.c.bf16 %v429_v7, %v427_v14  ;;  %804 = vadd.xlane.f32.xlu0 %v803_v8  ;;  %v1830_v32 = vmul.f32 %v1253_v21, %v1744_v55  ;;  %v1833_v54 = vmul.f32 %v1253_v21, %v1751_v26 }
 0x279   :  { %514 = vmatprep.subr.bf16.mxu1 %v436_v6  ;;  %v923_v25 = vpack.c.bf16 %v1827_v36, %v1824_v23  ;;  %v1838_v16 = vmul.f32 %v1255_v51, %v1769_v0  ;;  %v1841_v38 = vmul.f32 %v1255_v51, %v1775_v41  ;;  %v57_v41 = vld [vmem:[%s1988_s5] sm:$0xff] }
 0x27a   :  { %515 = vmatpush1.bf16.msra.mxu1 %v435_v20  ;;  %v922_v19 = vpack.c.bf16 %v1833_v54, %v1830_v32 }
 0x27b   :  { %v1257_v28 = vpop.eup %1256  ;;  %v920_v55 = vpack.c.bf16 %v1841_v38, %v1838_v16 }
 0x27c   :  { %v1848_v26 = vmul.f32 %v1257_v28, %v1773_v40  ;;  %v1851_v27 = vmul.f32 %v1257_v28, %v1779_v1  ;;  %v60_v40 = vld [vmem:[%s1988_s5 + $0x18] sm:$0xff]  ;;  %v58_v1 = vld [vmem:[%s1988_s5 + $0x8] sm:$0xff] }
 0x27e   :  { %v921_v0 = vpack.c.bf16 %v1851_v27, %v1848_v26 }
 0x283   :  { %559 = vperm.xlu1 %1161, %v57_v41  }
 0x287   :  { %569 = vperm.xlu1 %1161, %v59_v46  }
 0x28b   :  { %574 = vperm.xlu1 %1161, %v60_v40  }
 0x28e   :  { %564 = vperm.xlu0 %1160, %v58_v1  }
 0x2f7   :  { %v808_v31 = vpop.xlane.xlu1 %807 }
 0x2fb   :  { %v802_v14 = vpop.xlane.xlu1 %801 }
 0x2fd   :  { %v811_v8 = vpop.xlane.xlu0 %810 }
 0x2fe   :  { %1258 = vrcp.f32 %v811_v8 }
 0x2ff   :  { %1260 = vrcp.f32 %v808_v31  ;;  %v1943_v17 = vpop.permute.xlu1 %559 }
 0x301   :  { %v805_v61 = vpop.xlane.xlu0 %804 }
 0x302   :  { %1262 = vrcp.f32 %v805_v61 }
 0x303   :  { %1264 = vrcp.f32 %v802_v14  ;;  %v1950_v36 = vpop.permute.xlu1 %569 }
 0x307   :  { %v1955_v16 = vpop.permute.xlu1 %574 }
 0x308   :  { %v473_v12 = vpop.f32.mrf.mxu1 }
 0x309   :  { %v488_v63 = vmul.f32 %v473_v12, %v1870_v56 }
 0x30a   :  { %v475_v24 = vpop.f32.mrf.mxu1 }
 0x30b   :  { %v1259_v28 = vpop.eup %1258 }
 0x30c   :  { %v476_v62 = vpop.f32.mrf.mxu1  ;;  %v1261_v40 = vpop.eup %1260  ;;  %v823_v24 = vmul.f32 %v1259_v28, %v1809_v50 }
 0x30d   :  { %v489_v11 = vmul.f32 %v476_v62, %v1875_v45  ;;  %v820_v50 = vmul.f32 %v1261_v40, %v1791_v4 }
 0x30e   :  { %v478_v57 = vpop.f32.mrf.mxu1 }
 0x30f   :  { %v492_v47 = vpack.c.bf16 %v489_v11, %v488_v63  ;;  %v1263_v62 = vpop.eup %1262  ;;  %v821_v63 = vmul.f32 %v1261_v40, %v1793_v30 }
 0x310   :  { %v481_v13 = vpop.f32.mrf.mxu1  ;;  %v1265_v11 = vpop.eup %1264 }
 0x311   :  { %1132 = vmatmul.mubr.msk.bf16.vlgmr.msra.gmra.mxu1 %vm163_vm0, %v492_v47  ;;  %v490_v53 = vmul.f32 %v481_v13, %v1883_v22  ;;  %v822_v47 = vmul.f32 %v1259_v28, %v1805_v42  ;;  %v827_v13 = vpack.c.bf16 %v823_v24, %v821_v63  ;;  %v818_v42 = vmul.f32 %v1263_v62, %v1811_v33  ;;  %v2039_v33 = vld [vmem:[#allocation16_spill] sm:$0xff] }
 0x312   :  { %v483_v59 = vpop.f32.mrf.mxu1  ;;  %542 = vmatprep.mubr.bf16.mxu1 %v2029_v37  ;;  %v816_v4 = vmul.f32 %v1265_v11, %v1799_v49 }
 0x313   :  { %v1901_v59 = vld [vmem:[%s1987_s4] sm:$0xff]  }
 0x314   :  { %v484_v39 = vpop.f32.mrf.mxu1 }
 0x315   :  { %v491_v58 = vmul.f32 %v484_v39, %v1888_v48  ;;  %v819_v39 = vmul.f32 %v1263_v62, %v1815_v34  ;;  %v1913_v34 = vld [vmem:[%s1987_s4 + $0x8] sm:$0xff]   ;;  %s1289_s4 = smov [#allocation2]  }
 0x316   :  { %v486_v15 = vpop.f32.mrf.mxu1  ;;  %s1109_s30 = sshll.u32 %s1289_s4, 4  ;;  %s1110_s30 = int_to_ptr.vmem [resolvable:$true] %s1109_s30 }
 0x317   :  { %v493_v2 = vpack.c.bf16 %v491_v58, %v490_v53  ;;  %v817_v53 = vmul.f32 %v1265_v11, %v1803_v44  ;;  %v826_v58 = vpack.c.bf16 %v822_v47, %v820_v50  ;;  %v824_v15 = vpack.c.bf16 %v818_v42, %v816_v4  ;;  %v2038_v44 = vld [vmem:[#allocation17_spill] sm:$0xff]  ;;  %s1266_s7 = scalar_lea.vmem %s1110_s30, 2048  ;;  %p1271_p1 = scmp.lt.s32.totalorder %s1110_s30, %s1110_s30 }
 0x318   :  { %p1267_p0 = scmp.ne.s32.totalorder %s1110_s30, %s1266_s7  ;;  %p1272_p2 = scmp.lt.s32.totalorder %s1266_s7, %s1266_s7 }
 0x319   :  { %1133 = vmatmul.mubr.msk.bf16.gmra.mxu1 %vm163_vm0, %v493_v2  ;;  %v825_v30 = vpack.c.bf16 %v819_v39, %v817_v53  ;;  %v2040_v2 = vpack.c.bf16 %v2038_v44, %v2039_v33 }
 0x31a   :  { %625 = vmatprep.mubr.bf16.mxu1 %v2029_v37  ;;  %p1273_p3 = por %p1272_p2, %p1271_p1 }
 0x31c   :  { %p1274_p4 = pnand %p1273_p3, %p1267_p0 }
 0x3d1   :  { %v534_v10 = vpop.f32.mrf.mxu1 }
 0x3d3   :  { %v536_v35 = vpop.f32.mrf.mxu1 }
 0x3d5   :  { %v538_v7 = vpop.f32.mrf.mxu1 }
 0x3d6   :  { %v553_v57 = vpack.c.bf16 %v538_v7, %v534_v10 }
 0x3d7   :  { %v540_v21 = vpop.f32.mrf.mxu1 }
 0x3d8   :  { %v554_v12 = vpack.c.bf16 %v540_v21, %v536_v35 }
 0x3d9   :  { %v544_v6 = vpop.f32.mrf.mxu1 }
 0x3db   :  { %v546_v51 = vpop.f32.mrf.mxu1 }
 0x3dd   :  { %v548_v20 = vpop.f32.mrf.mxu1 }
 0x3de   :  { %v555_v1 = vpack.c.bf16 %v548_v20, %v544_v6 }
 0x3df   :  { %v550_v41 = vpop.f32.mrf.mxu1 }
 0x3e0   :  { %v556_v46 = vpack.c.bf16 %v550_v41, %v546_v51 }
 0x3e2   :  { %605 = vmatprep.subr.bf16.mxu1 %v556_v46 }
 0x3e3   :  { %606 = vmatpush1.bf16.msra.mxu1 %v555_v1 }
 0x3e4   :  { %607 = vmatprep.subr.bf16.mxu1 %v554_v12 }
 0x3e7   :  { %608 = vmatpush1.bf16.msra.mxu1 %v553_v57 }
 0x3e8   :  { %936 = vmatprep.subr.bf16.mxu1 %v827_v13 }
 0x3ea   :  { %1136 = vmatmul.mubr.msk.bf16.vlgmr.msra.gmra.mxu1 %vm163_vm0, %v1901_v59 }
 0x3eb   :  { %937 = vmatpush1.bf16.xpose.msra.mxu1 %v826_v58  ;;  %635 = vmatprep.mubr.bf16.mxu1 %v2029_v37 }
 0x3ec   :  { %938 = vmatprep.subr.bf16.mxu1 %v825_v30 }
 0x3f2   :  { %1137 = vmatmul.mubr.msk.bf16.gmra.mxu1 %vm163_vm0, %v1913_v34 }
 0x3f3   :  { %939 = vmatpush1.bf16.xpose.msra.mxu1 %v824_v15  ;;  %956 = vmatprep.mubr.bf16.mxu1 %v761_v9 }
 0x3f4   :  { %997 = vmatprep.subr.bf16.mxu1 %v923_v25 }
 0x3fa   :  { %957 = vmatmul.mubr.bf16.vlgmr.msra.gmra.mxu1 %v2040_v2 }
 0x3fb   :  { %964 = vmatprep.mubr.bf16.mxu1 %v763_v60  ;;  %998 = vmatpush1.bf16.msra.mxu1 %v922_v19  ;;  %v1947_v60 = vpop.permute.xlu0 %564 }
 0x3fc   :  { %999 = vmatprep.subr.bf16.mxu1 %v921_v0 }
 0x3ff   :  { %1000 = vmatpush1.bf16.msra.mxu1 %v920_v55 }
 0x402   :  { %965 = vmatmul.mubr.bf16.gmra.mxu1 %v762_v52 }
 0x403   :  { %1017 = vmatprep.mubr.bf16.mxu1 %v2029_v37 }
 0x4aa   :  { %v627_v3 = vpop.f32.mrf.mxu1 }
 0x4ab   :  { %v628_v5 = vadd.f32 %v627_v3, %v1943_v17 }
 0x4ac   :  { %v629_v18 = vpop.f32.mrf.mxu1 }
 0x4ad   :  { %646 = vst [vmem:[#allocation2] sm:$0xff] %v628_v5  ;;  %v630_v9 = vadd.f32 %v629_v18, %v1943_v17 }
 0x4ae   :  { %v631_v49 = vpop.f32.mrf.mxu1 }
 0x4af   :  { %647 = vst [vmem:[#allocation2 + $0x8] sm:$0xff] %v630_v9  ;;  %v632_v23 = vadd.f32 %v631_v49, %v1947_v60 }
 0x4b0   :  { %v633_v43 = vpop.f32.mrf.mxu1 }
 0x4b1   :  { %648 = vst [vmem:[#allocation2 + $0x10] sm:$0xff] %v632_v23  ;;  %v634_v29 = vadd.f32 %v633_v43, %v1947_v60 }
 0x4b2   :  { %v637_v52 = vpop.f32.mrf.mxu1 }
 0x4b3   :  { %649 = vst [vmem:[#allocation2 + $0x18] sm:$0xff] %v634_v29  ;;  %v638_v32 = vadd.f32 %v637_v52, %v1950_v36 }
 0x4b4   :  { %v639_v54 = vpop.f32.mrf.mxu1 }
 0x4b5   :  { %650 = vst [vmem:[#allocation2 + $0x20] sm:$0xff] %v638_v32  ;;  %v640_v25 = vadd.f32 %v639_v54, %v1950_v36 }
 0x4b6   :  { %v641_v38 = vpop.f32.mrf.mxu1 }
 0x4b7   :  { %651 = vst [vmem:[#allocation2 + $0x28] sm:$0xff] %v640_v25  ;;  %v642_v19 = vadd.f32 %v641_v38, %v1955_v16 }
 0x4b8   :  { %v643_v55 = vpop.f32.mrf.mxu1 }
 0x4b9   :  { %652 = vst [vmem:[#allocation2 + $0x30] sm:$0xff] %v642_v19  ;;  %v644_v26 = vadd.f32 %v643_v55, %v1955_v16 }
 0x4ba   :  { %v958_v27 = vpop.f32.mrf.mxu1 }
 0x4bb   :  { %653 = vst [vmem:[#allocation2 + $0x38] sm:$0xff] %v644_v26  ;;  %v973_v31 = vmul.f32 %v958_v27, %v1870_v56 }
 0x4bc   :  { %v960_v0 = vpop.f32.mrf.mxu1 }
 0x4be   :  { %v961_v8 = vpop.f32.mrf.mxu1 }
 0x4bf   :  { %v974_v10 = vmul.f32 %v961_v8, %v1875_v45 }
 0x4c0   :  { %v963_v61 = vpop.f32.mrf.mxu1 }
 0x4c1   :  { %v977_v35 = vpack.c.bf16 %v974_v10, %v973_v31 }
 0x4c2   :  { %v966_v14 = vpop.f32.mrf.mxu1 }
 0x4c3   :  { %1152 = vmatmul.mubr.msk.bf16.vlgmr.msra.gmra.mxu1 %vm163_vm0, %v977_v35  ;;  %v975_v6 = vmul.f32 %v966_v14, %v1883_v22 }
 0x4c4   :  { %v968_v7 = vpop.f32.mrf.mxu1  ;;  %1027 = vmatprep.mubr.bf16.mxu1 %v2029_v37 }
 0x4c6   :  { %v969_v21 = vpop.f32.mrf.mxu1 }
 0x4c7   :  { %v976_v51 = vmul.f32 %v969_v21, %v1888_v48 }
 0x4c8   :  { %v971_v20 = vpop.f32.mrf.mxu1 }
 0x4c9   :  { %v978_v28 = vpack.c.bf16 %v976_v51, %v975_v6 }
 0x4cb   :  { %1153 = vmatmul.mubr.msk.bf16.gmra.mxu1 %vm163_vm0, %v978_v28 }
 0x4cc   :  { %1074 = vmatprep.mubr.bf16.mxu1 %v2029_v37 }
 0x583   :  { %v1019_v56 = vpop.f32.mrf.mxu1 }
 0x585   :  { %v1021_v45 = vpop.f32.mrf.mxu1 }
 0x587   :  { %v1023_v41 = vpop.f32.mrf.mxu1 }
 0x588   :  { %v1038_v22 = vpack.c.bf16 %v1023_v41, %v1019_v56 }
 0x589   :  { %v1025_v46 = vpop.f32.mrf.mxu1 }
 0x58a   :  { %v1039_v11 = vpack.c.bf16 %v1025_v46, %v1021_v45 }
 0x58b   :  { %v1029_v40 = vpop.f32.mrf.mxu1 }
 0x58d   :  { %v1031_v1 = vpop.f32.mrf.mxu1 }
 0x58f   :  { %v1033_v12 = vpop.f32.mrf.mxu1 }
 0x590   :  { %v1040_v63 = vpack.c.bf16 %v1033_v12, %v1029_v40 }
 0x591   :  { %v1035_v24 = vpop.f32.mrf.mxu1 }
 0x592   :  { %v1041_v62 = vpack.c.bf16 %v1035_v24, %v1031_v1 }
 0x594   :  { %1054 = vmatprep.subr.bf16.mxu1 %v1041_v62 }
 0x595   :  { %1055 = vmatpush1.bf16.msra.mxu1 %v1040_v63 }
 0x596   :  { %1056 = vmatprep.subr.bf16.mxu1 %v1039_v11 }
 0x599   :  { %1057 = vmatpush1.bf16.msra.mxu1 %v1038_v22 }
 0x59c   :  { %1154 = vmatmul.mubr.msk.bf16.vlgmr.msra.gmra.mxu1 %vm163_vm0, %v1901_v59 }
 0x59d   :  { %1084 = vmatprep.mubr.bf16.mxu1 %v2029_v37 }
 0x5a4   :  { %1155 = vmatmul.mubr.msk.bf16.gmra.mxu1 %vm163_vm0, %v1913_v34 }
 0x65c   :  { %v1076_v48 = vpop.f32.mrf.mxu1 }
 0x65d   :  { %v1077_v57 = vadd.f32 %v1076_v48, %v1943_v17 }
 0x65e   :  { %v1078_v47 = vpop.f32.mrf.mxu1 }
 0x65f   :  { %1096 = vst [vmem:[#allocation2 + $0x40] sm:$0xff] %v1077_v57  ;;  %v1079_v13 = vadd.f32 %v1078_v47, %v1943_v17 }
 0x660   :  { %v1080_v39 = vpop.f32.mrf.mxu1 }
 0x661   :  { %1097 = vst [vmem:[#allocation2 + $0x48] sm:$0xff] %v1079_v13  ;;  %v1081_v50 = vadd.f32 %v1080_v39, %v1947_v60 }
 0x662   :  { %v1082_v53 = vpop.f32.mrf.mxu1 }
 0x663   :  { %1098 = vst [vmem:[#allocation2 + $0x50] sm:$0xff] %v1081_v50  ;;  %v1083_v59 = vadd.f32 %v1082_v53, %v1947_v60 }
 0x664   :  { %v1086_v58 = vpop.f32.mrf.mxu1 }
 0x665   :  { %1099 = vst [vmem:[#allocation2 + $0x58] sm:$0xff] %v1083_v59  ;;  %v1087_v37 = vadd.f32 %v1086_v58, %v1950_v36 }
 0x666   :  { %v1088_v30 = vpop.f32.mrf.mxu1 }
 0x667   :  { %1100 = vst [vmem:[#allocation2 + $0x60] sm:$0xff] %v1087_v37  ;;  %v1089_v42 = vadd.f32 %v1088_v30, %v1950_v36 }
 0x668   :  { %v1090_v34 = vpop.f32.mrf.mxu1 }
 0x669   :  { %1101 = vst [vmem:[#allocation2 + $0x68] sm:$0xff] %v1089_v42  ;;  %v1091_v4 = vadd.f32 %v1090_v34, %v1955_v16 }
 0x66a   :  { %v1092_v15 = vpop.f32.mrf.mxu1 }
 0x66b   :  { %1102 = vst [vmem:[#allocation2 + $0x70] sm:$0xff] %v1091_v4  ;;  %v1093_v44 = vadd.f32 %v1092_v15, %v1955_v16 }
 0x66d   :  { %1103 = vst [vmem:[#allocation2 + $0x78] sm:$0xff] %v1093_v44 }
 0x66e   :  { %1277 = shalt.err (!%p1274_p4)
}
 0x66f   :  { %s1290_s8 = smov 256   ;;  %s1291_s9 = smov 16  }
 0x670   :  { %1115 = dma.vmem_to_hbm [thread:$0]  %s1110_s30, 2048, %s1989_s6, [#allocation3], %s1290_s8, %s1290_s8, %s1291_s9  }
 0x671   :  { %1286 = dma.done.wait [#allocation3], 2048  }
 0x672   :  { %1287 = vsyncadd [#allocation3], 4294965248 }
 0x673   :  { %1119 = vsyncpa [#allocation3], 1 }

</bundles_post_ra>
